<compile_context>
chip_gen: v7x
topology: tpu7x:2x2x1
jax: 0.10.0
libtpu: 0.0.40
codegen_flags: <defaults>
</compile_context>

<pallas_src>
import functools

import jax
import jax.numpy as jnp
from jax import lax
from jax.experimental import pallas as pl
from jax.experimental.pallas import tpu as pltpu

DEGREE = 10
NUM_FEATURES = 60
HIDDEN = 30


def _poly_rnn_kernel(x_ref,        # (S*B, F)      input rows, flattened in wrapper
                     wih_ref,      # (F, 2H)       [W_ih_f^T | W_ih_b^T]
                     bih_ref,      # (1, 2H)       (b_ih + b_hh) for both directions
                     whh_ref,      # (2H, 2H)      block-diag(W_hh_f^T, W_hh_b^T)
                     wpoly_f_ref,  # (2H, DEGREE)  [W_poly^T[:H] ; 0]
                     wpoly_b_ref,  # (2H, DEGREE)  [0 ; W_poly^T[H:]]
                     bpoly_ref,    # (1, DEGREE)
                     wfc_ref,      # (1, DEGREE)
                     bfc_ref,      # (1, 1)
                     out_ref,      # (S*B, 1)
                     hf_scratch,   # VMEM (S*B, 2H): row-block t = fwd state at time t
                     hb_scratch,   # VMEM (S*B, 2H): row-block t = bwd state at time t
                     *, seq_len, batch):
    S, B, H = seq_len, batch, HIDDEN

    # --- One-shot input projection for BOTH directions, biases folded in. ---
    xproj = (jnp.dot(x_ref[...], wih_ref[...], preferred_element_type=jnp.float32)
             + bih_ref[...])                                            # (S*B, 2H)

    # Lane mask (hoisted): lanes [:H] -> forward dir, lanes [H:] -> backward dir.
    lane = lax.broadcasted_iota(jnp.int32, (B, 2 * H), 1)
    is_fwd_lane = lane < H

    whh = whh_ref[...]                                                  # hoist (2H,2H)

    # --- Fused bidirectional recurrence: ONE (B,2H)x(2H,2H) dot + tanh per step. ---
    h = jnp.zeros((B, 2 * H), jnp.float32)                              # [h_f | h_b]
    for i in range(S):                                                  # S static & tiny
        rev = S - 1 - i
        # fwd half consumes x[i], bwd half consumes x[S-1-i]: one lane select.
        xp_i = jnp.where(is_fwd_lane,
                         xproj[i * B:(i + 1) * B, :],
                         xproj[rev * B:(rev + 1) * B, :])
        h = jnp.tanh(xp_i + jnp.dot(h, whh, preferred_element_type=jnp.float32))
        # Full-width, 8-row-aligned stores (off the recurrence critical path).
        # Wrong halves are zeroed later by the padded poly weights.
        hf_scratch[pl.ds(i * B, B), :] = h                              # fwd at time i
        hb_scratch[pl.ds(rev * B, B), :] = h                            # bwd at time rev

    # --- Batched head over all S*B rows: poly Linear -> ReLU -> fc -> ReLU. ---
    p = (jnp.dot(hf_scratch[...], wpoly_f_ref[...], preferred_element_type=jnp.float32)
         + jnp.dot(hb_scratch[...], wpoly_b_ref[...], preferred_element_type=jnp.float32)
         + bpoly_ref[...])                                              # (S*B, DEGREE)
    p = jnp.maximum(p, 0.0)
    # fc is (DEGREE -> 1): VPU multiply + lane reduction instead of an N=1 MXU matmul.
    o = jnp.sum(p * wfc_ref[...], axis=-1, keepdims=True) + bfc_ref[...]  # (S*B, 1)
    out_ref[...] = jnp.maximum(o, 0.0)


def polynomial_regression_forward(x, params):
    S, B, F = x.shape
    assert F == NUM_FEATURES
    x2d = x.reshape(S * B, F)            # wrapper-side reshape: XLA metadata, free
    vmem = pl.BlockSpec(memory_space=pltpu.MemorySpace.VMEM)
    kernel = functools.partial(_poly_rnn_kernel, seq_len=S, batch=B)
    out2d = pl.pallas_call(
        kernel,
        out_shape=jax.ShapeDtypeStruct((S * B, 1), jnp.float32),
        in_specs=[vmem] * (1 + len(params)),
        out_specs=vmem,
        scratch_shapes=[pltpu.VMEM((S * B, 2 * HIDDEN), jnp.float32),
                        pltpu.VMEM((S * B, 2 * HIDDEN), jnp.float32)],
    )(x2d, *params)
    return out2d.reshape(S, B, 1)        # wrapper-side reshape back to (S, B, 1)


def init_params(key):
    """Deterministic init matching the PyTorch shapes; weights pre-transposed
    (x @ W), RNN input weights/biases combined across directions, recurrent
    weights pre-packed block-diagonally, poly weight halves zero-padded."""
    ks = jax.random.split(key, 12)

    def unif(k, shape, bound):
        return jax.random.uniform(k, shape, jnp.float32, -bound, bound)

    # nn.RNN(60, 30, bidirectional=True): U(-1/sqrt(H), 1/sqrt(H))
    bh = 1.0 / (HIDDEN ** 0.5)
    wih_f = unif(ks[0], (NUM_FEATURES, HIDDEN), bh)                     # W_ih_l0^T
    whh_f = unif(ks[1], (HIDDEN, HIDDEN), bh)                           # W_hh_l0^T
    b_f = unif(ks[2], (1, HIDDEN), bh) + unif(ks[3], (1, HIDDEN), bh)   # b_ih + b_hh
    wih_b = unif(ks[4], (NUM_FEATURES, HIDDEN), bh)                     # reverse dir
    whh_b = unif(ks[5], (HIDDEN, HIDDEN), bh)
    b_b = unif(ks[6], (1, HIDDEN), bh) + unif(ks[7], (1, HIDDEN), bh)

    wih = jnp.concatenate([wih_f, wih_b], axis=1)                       # (60, 2H)
    bih = jnp.concatenate([b_f, b_b], axis=1)                           # (1, 2H)
    whh_bd = jnp.zeros((2 * HIDDEN, 2 * HIDDEN), jnp.float32)           # block-diagonal
    whh_bd = whh_bd.at[:HIDDEN, :HIDDEN].set(whh_f)
    whh_bd = whh_bd.at[HIDDEN:, HIDDEN:].set(whh_b)

    # nn.Linear(60, 10): U(-1/sqrt(60), 1/sqrt(60)); split W^T into zero-padded halves.
    bp = 1.0 / ((2 * HIDDEN) ** 0.5)
    wpoly = unif(ks[8], (2 * HIDDEN, DEGREE), bp)                       # W_poly^T
    bpoly = unif(ks[9], (1, DEGREE), bp)
    zeros_h = jnp.zeros((HIDDEN, DEGREE), jnp.float32)
    wpoly_f_pad = jnp.concatenate([wpoly[:HIDDEN], zeros_h], axis=0)    # (2H, DEGREE)
    wpoly_b_pad = jnp.concatenate([zeros_h, wpoly[HIDDEN:]], axis=0)    # (2H, DEGREE)

    # nn.Linear(10, 1): keep W as a (1, DEGREE) row for the VPU mul+sum.
    bfcb = 1.0 / (DEGREE ** 0.5)
    wfc_row = unif(ks[10], (1, DEGREE), bfcb)
    bfc = unif(ks[11], (1, 1), bfcb)

    return (wih, bih, whh_bd, wpoly_f_pad, wpoly_b_pad, bpoly, wfc_row, bfc)


def _reference_forward(x, params):
    """Pure-JAX reference with explicit fwd/bwd recurrences (PyTorch semantics)."""
    wih, bih, whh_bd, wpoly_f_pad, wpoly_b_pad, bpoly, wfc, bfc = params
    S, B, F = x.shape
    H = HIDDEN
    wih_f, wih_b = wih[:, :H], wih[:, H:]
    b_f, b_b = bih[:, :H], bih[:, H:]
    whh_f, whh_b = whh_bd[:H, :H], whh_bd[H:, H:]
    h_f = jnp.zeros((B, H), jnp.float32)
    h_b = jnp.zeros((B, H), jnp.float32)
    outs_f = [None] * S
    outs_b = [None] * S
    for t in range(S):
        h_f = jnp.tanh(x[t] @ wih_f + b_f + h_f @ whh_f)
        outs_f[t] = h_f
    for t in range(S - 1, -1, -1):
        h_b = jnp.tanh(x[t] @ wih_b + b_b + h_b @ whh_b)
        outs_b[t] = h_b
    hid = jnp.stack([jnp.concatenate([outs_f[t], outs_b[t]], axis=-1)
                     for t in range(S)], axis=0)                        # (S, B, 2H)
    wpoly = wpoly_f_pad + wpoly_b_pad                                   # (2H, DEGREE)
    p = jnp.maximum(hid @ wpoly + bpoly, 0.0)
    o = jnp.maximum(jnp.sum(p * wfc, axis=-1, keepdims=True) + bfc, 0.0)
    return o


if __name__ == "__main__":
    key = jax.random.PRNGKey(0)
    k_x, k_p = jax.random.split(key)

    # Module-level constants: batch_size=4, time_steps=8, num_features=60.
    # (nn.RNN with batch_first=False treats dim0 as the sequence axis.)
    x = jax.random.normal(k_x, (4, 8, NUM_FEATURES), dtype=jnp.float32)
    params = init_params(k_p)

    out = jax.block_until_ready(polynomial_regression_forward(x, params))
    assert out.shape == (4, 8, 1)
    assert bool(jnp.all(out >= 0.0))                                    # final ReLU

    ref = _reference_forward(x, params)
    assert bool(jnp.allclose(out, ref, atol=1e-2, rtol=1e-2)), \
        float(jnp.max(jnp.abs(out - ref)))
    print("KERNEL_OK")
</pallas_src>

<mosaic_0001>
module attributes {stable_mosaic.version = 11 : i64} {
  func.func @_poly_rnn_kernel(%arg0: memref<32x60xf32, #tpu.memory_space<vmem>>, %arg1: memref<60x60xf32, #tpu.memory_space<vmem>>, %arg2: memref<1x60xf32, #tpu.memory_space<vmem>>, %arg3: memref<60x60xf32, #tpu.memory_space<vmem>>, %arg4: memref<60x10xf32, #tpu.memory_space<vmem>>, %arg5: memref<60x10xf32, #tpu.memory_space<vmem>>, %arg6: memref<1x10xf32, #tpu.memory_space<vmem>>, %arg7: memref<1x10xf32, #tpu.memory_space<vmem>>, %arg8: memref<1x1xf32, #tpu.memory_space<vmem>>, %arg9: memref<32x1xf32, #tpu.memory_space<vmem>>, %arg10: memref<32x60xf32, #tpu.memory_space<vmem>>, %arg11: memref<32x60xf32, #tpu.memory_space<vmem>>) attributes {dimension_semantics = [], scalar_prefetch = 0 : i64, scratch_operands = 2 : i64, tpu.core_type = #tpu.core_type<tc>} {
    %c0 = arith.constant 0 : index
    %c0_0 = arith.constant 0 : index
    %0 = vector.load %arg0[%c0, %c0_0] : memref<32x60xf32, #tpu.memory_space<vmem>>, vector<32x60xf32>
    %c0_1 = arith.constant 0 : index
    %c0_2 = arith.constant 0 : index
    %1 = vector.load %arg1[%c0_1, %c0_2] : memref<60x60xf32, #tpu.memory_space<vmem>>, vector<60x60xf32>
    %cst = arith.constant dense<0.000000e+00> : vector<32x60xf32>
    %2 = tpu.matmul %0, %1, %cst {dimension_numbers = #tpu.dot_dimension_numbers<[1], [0], [0], [1], [0, 0, 1, 1], [], []>} : vector<32x60xf32>, vector<60x60xf32>, vector<32x60xf32> -> vector<32x60xf32>
    %c0_3 = arith.constant 0 : index
    %c0_4 = arith.constant 0 : index
    %3 = vector.load %arg2[%c0_3, %c0_4] : memref<1x60xf32, #tpu.memory_space<vmem>>, vector<1x60xf32>
    %4 = vector.broadcast %3 : vector<1x60xf32> to vector<32x60xf32>
    %5 = arith.addf %2, %4 : vector<32x60xf32>
    %6 = tpu.iota {dimensions = array<i32: 1>} : vector<8x60xi32>
    %c30_i32 = arith.constant 30 : i32
    %7 = vector.broadcast %c30_i32 : i32 to vector<8x60xi32>
    %8 = arith.cmpi slt, %6, %7 : vector<8x60xi32>
    %c0_5 = arith.constant 0 : index
    %c0_6 = arith.constant 0 : index
    %9 = vector.load %arg3[%c0_5, %c0_6] : memref<60x60xf32, #tpu.memory_space<vmem>>, vector<60x60xf32>
    %cst_7 = arith.constant 0.000000e+00 : f32
    %10 = vector.broadcast %cst_7 : f32 to vector<8x60xf32>
    %11 = vector.extract_strided_slice %5 {offsets = [0, 0], sizes = [8, 60], strides = [1, 1]} : vector<32x60xf32> to vector<8x60xf32>
    %12 = vector.extract_strided_slice %5 {offsets = [24, 0], sizes = [8, 60], strides = [1, 1]} : vector<32x60xf32> to vector<8x60xf32>
    %13 = arith.select %8, %11, %12 : vector<8x60xi1>, vector<8x60xf32>
    %cst_8 = arith.constant dense<0.000000e+00> : vector<8x60xf32>
    %14 = tpu.matmul %10, %9, %cst_8 {dimension_numbers = #tpu.dot_dimension_numbers<[1], [0], [0], [1], [0, 0, 1, 1], [], []>} : vector<8x60xf32>, vector<60x60xf32>, vector<8x60xf32> -> vector<8x60xf32>
    %15 = arith.addf %13, %14 : vector<8x60xf32>
    %16 = math.tanh %15 : vector<8x60xf32>
    %c0_9 = arith.constant 0 : index
    %c0_10 = arith.constant 0 : index
    %17 = vector.load %arg10[%c0_9, %c0_10] : memref<32x60xf32, #tpu.memory_space<vmem>>, vector<8x60xf32>
    tpu.vector_store %arg10[%c0_9, %c0_10], %16 {strides = array<i32>} : memref<32x60xf32, #tpu.memory_space<vmem>>, vector<8x60xf32>,
    %c24 = arith.constant 24 : index
    %c0_11 = arith.constant 0 : index
    %18 = vector.load %arg11[%c24, %c0_11] : memref<32x60xf32, #tpu.memory_space<vmem>>, vector<8x60xf32>
    tpu.vector_store %arg11[%c24, %c0_11], %16 {strides = array<i32>} : memref<32x60xf32, #tpu.memory_space<vmem>>, vector<8x60xf32>,
    %19 = vector.extract_strided_slice %5 {offsets = [8, 0], sizes = [8, 60], strides = [1, 1]} : vector<32x60xf32> to vector<8x60xf32>
    %20 = vector.extract_strided_slice %5 {offsets = [16, 0], sizes = [8, 60], strides = [1, 1]} : vector<32x60xf32> to vector<8x60xf32>
    %21 = arith.select %8, %19, %20 : vector<8x60xi1>, vector<8x60xf32>
    %cst_12 = arith.constant dense<0.000000e+00> : vector<8x60xf32>
    %22 = tpu.matmul %16, %9, %cst_12 {dimension_numbers = #tpu.dot_dimension_numbers<[1], [0], [0], [1], [0, 0, 1, 1], [], []>} : vector<8x60xf32>, vector<60x60xf32>, vector<8x60xf32> -> vector<8x60xf32>
    %23 = arith.addf %21, %22 : vector<8x60xf32>
    %24 = math.tanh %23 : vector<8x60xf32>
    %c8 = arith.constant 8 : index
    %c0_13 = arith.constant 0 : index
    %25 = vector.load %arg10[%c8, %c0_13] : memref<32x60xf32, #tpu.memory_space<vmem>>, vector<8x60xf32>
    tpu.vector_store %arg10[%c8, %c0_13], %24 {strides = array<i32>} : memref<32x60xf32, #tpu.memory_space<vmem>>, vector<8x60xf32>,
    %c16 = arith.constant 16 : index
    %c0_14 = arith.constant 0 : index
    %26 = vector.load %arg11[%c16, %c0_14] : memref<32x60xf32, #tpu.memory_space<vmem>>, vector<8x60xf32>
    tpu.vector_store %arg11[%c16, %c0_14], %24 {strides = array<i32>} : memref<32x60xf32, #tpu.memory_space<vmem>>, vector<8x60xf32>,
    %27 = vector.extract_strided_slice %5 {offsets = [16, 0], sizes = [8, 60], strides = [1, 1]} : vector<32x60xf32> to vector<8x60xf32>
    %28 = vector.extract_strided_slice %5 {offsets = [8, 0], sizes = [8, 60], strides = [1, 1]} : vector<32x60xf32> to vector<8x60xf32>
    %29 = arith.select %8, %27, %28 : vector<8x60xi1>, vector<8x60xf32>
    %cst_15 = arith.constant dense<0.000000e+00> : vector<8x60xf32>
    %30 = tpu.matmul %24, %9, %cst_15 {dimension_numbers = #tpu.dot_dimension_numbers<[1], [0], [0], [1], [0, 0, 1, 1], [], []>} : vector<8x60xf32>, vector<60x60xf32>, vector<8x60xf32> -> vector<8x60xf32>
    %31 = arith.addf %29, %30 : vector<8x60xf32>
    %32 = math.tanh %31 : vector<8x60xf32>
    %c16_16 = arith.constant 16 : index
    %c0_17 = arith.constant 0 : index
    %33 = vector.load %arg10[%c16_16, %c0_17] : memref<32x60xf32, #tpu.memory_space<vmem>>, vector<8x60xf32>
    tpu.vector_store %arg10[%c16_16, %c0_17], %32 {strides = array<i32>} : memref<32x60xf32, #tpu.memory_space<vmem>>, vector<8x60xf32>,
    %c8_18 = arith.constant 8 : index
    %c0_19 = arith.constant 0 : index
    %34 = vector.load %arg11[%c8_18, %c0_19] : memref<32x60xf32, #tpu.memory_space<vmem>>, vector<8x60xf32>
    tpu.vector_store %arg11[%c8_18, %c0_19], %32 {strides = array<i32>} : memref<32x60xf32, #tpu.memory_space<vmem>>, vector<8x60xf32>,
    %35 = vector.extract_strided_slice %5 {offsets = [24, 0], sizes = [8, 60], strides = [1, 1]} : vector<32x60xf32> to vector<8x60xf32>
    %36 = vector.extract_strided_slice %5 {offsets = [0, 0], sizes = [8, 60], strides = [1, 1]} : vector<32x60xf32> to vector<8x60xf32>
    %37 = arith.select %8, %35, %36 : vector<8x60xi1>, vector<8x60xf32>
    %cst_20 = arith.constant dense<0.000000e+00> : vector<8x60xf32>
    %38 = tpu.matmul %32, %9, %cst_20 {dimension_numbers = #tpu.dot_dimension_numbers<[1], [0], [0], [1], [0, 0, 1, 1], [], []>} : vector<8x60xf32>, vector<60x60xf32>, vector<8x60xf32> -> vector<8x60xf32>
    %39 = arith.addf %37, %38 : vector<8x60xf32>
    %40 = math.tanh %39 : vector<8x60xf32>
    %c24_21 = arith.constant 24 : index
    %c0_22 = arith.constant 0 : index
    %41 = vector.load %arg10[%c24_21, %c0_22] : memref<32x60xf32, #tpu.memory_space<vmem>>, vector<8x60xf32>
    tpu.vector_store %arg10[%c24_21, %c0_22], %40 {strides = array<i32>} : memref<32x60xf32, #tpu.memory_space<vmem>>, vector<8x60xf32>,
    %c0_23 = arith.constant 0 : index
    %c0_24 = arith.constant 0 : index
    %42 = vector.load %arg11[%c0_23, %c0_24] : memref<32x60xf32, #tpu.memory_space<vmem>>, vector<8x60xf32>
    tpu.vector_store %arg11[%c0_23, %c0_24], %40 {strides = array<i32>} : memref<32x60xf32, #tpu.memory_space<vmem>>, vector<8x60xf32>,
    %c0_25 = arith.constant 0 : index
    %c0_26 = arith.constant 0 : index
    %43 = vector.load %arg10[%c0_25, %c0_26] : memref<32x60xf32, #tpu.memory_space<vmem>>, vector<32x60xf32>
    %c0_27 = arith.constant 0 : index
    %c0_28 = arith.constant 0 : index
    %44 = vector.load %arg4[%c0_27, %c0_28] : memref<60x10xf32, #tpu.memory_space<vmem>>, vector<60x10xf32>
    %cst_29 = arith.constant dense<0.000000e+00> : vector<32x10xf32>
    %45 = tpu.matmul %43, %44, %cst_29 {dimension_numbers = #tpu.dot_dimension_numbers<[1], [0], [0], [1], [0, 0, 1, 1], [], []>} : vector<32x60xf32>, vector<60x10xf32>, vector<32x10xf32> -> vector<32x10xf32>
    %c0_30 = arith.constant 0 : index
    %c0_31 = arith.constant 0 : index
    %46 = vector.load %arg11[%c0_30, %c0_31] : memref<32x60xf32, #tpu.memory_space<vmem>>, vector<32x60xf32>
    %c0_32 = arith.constant 0 : index
    %c0_33 = arith.constant 0 : index
    %47 = vector.load %arg5[%c0_32, %c0_33] : memref<60x10xf32, #tpu.memory_space<vmem>>, vector<60x10xf32>
    %cst_34 = arith.constant dense<0.000000e+00> : vector<32x10xf32>
    %48 = tpu.matmul %46, %47, %cst_34 {dimension_numbers = #tpu.dot_dimension_numbers<[1], [0], [0], [1], [0, 0, 1, 1], [], []>} : vector<32x60xf32>, vector<60x10xf32>, vector<32x10xf32> -> vector<32x10xf32>
    %49 = arith.addf %45, %48 : vector<32x10xf32>
    %c0_35 = arith.constant 0 : index
    %c0_36 = arith.constant 0 : index
    %50 = vector.load %arg6[%c0_35, %c0_36] : memref<1x10xf32, #tpu.memory_space<vmem>>, vector<1x10xf32>
    %51 = vector.broadcast %50 : vector<1x10xf32> to vector<32x10xf32>
    %52 = arith.addf %49, %51 : vector<32x10xf32>
    %cst_37 = arith.constant 0.000000e+00 : f32
    %53 = vector.broadcast %cst_37 : f32 to vector<32x10xf32>
    %54 = arith.maximumf %52, %53 : vector<32x10xf32>
    %c0_38 = arith.constant 0 : index
    %c0_39 = arith.constant 0 : index
    %55 = vector.load %arg7[%c0_38, %c0_39] : memref<1x10xf32, #tpu.memory_space<vmem>>, vector<1x10xf32>
    %56 = vector.broadcast %55 : vector<1x10xf32> to vector<32x10xf32>
    %57 = arith.mulf %54, %56 : vector<32x10xf32>
    %cst_40 = arith.constant dense<0.000000e+00> : vector<32xf32>
    %58 = vector.multi_reduction <add>, %57, %cst_40 [1] : vector<32x10xf32> to vector<32xf32>
    %59 = vector.shape_cast %58 : vector<32xf32> to vector<32x1xf32>
    %c0_41 = arith.constant 0 : index
    %c0_42 = arith.constant 0 : index
    %60 = vector.load %arg8[%c0_41, %c0_42] : memref<1x1xf32, #tpu.memory_space<vmem>>, vector<1x1xf32>
    %61 = vector.broadcast %60 : vector<1x1xf32> to vector<32x1xf32>
    %62 = arith.addf %59, %61 : vector<32x1xf32>
    %cst_43 = arith.constant 0.000000e+00 : f32
    %63 = vector.broadcast %cst_43 : f32 to vector<32x1xf32>
    %64 = arith.maximumf %62, %63 : vector<32x1xf32>
    %c0_44 = arith.constant 0 : index
    %c0_45 = arith.constant 0 : index
    %65 = vector.load %arg9[%c0_44, %c0_45] : memref<32x1xf32, #tpu.memory_space<vmem>>, vector<32x1xf32>
    tpu.vector_store %arg9[%c0_44, %c0_45], %64 {strides = array<i32>} : memref<32x1xf32, #tpu.memory_space<vmem>>, vector<32x1xf32>,
    return
  }
}

</mosaic_0001>

<bundles_post_ra>
// kernel: tpu_custom_call.1
= control target key start
LH: loop header
LB: loop body
LE: loop exit
PB: predicated region body
PF: predicated region fallthrough
CT: control target
= control target key end

     0   :  { %v1130_v3 = vmov 0.0|0.0   ;;  %vm53_vm0 = vcmask 490496   ;;  %vm1131_vm1 = vmmov 0   ;;  %v1132_v6 = vmov 0.0   ;;  %s1406_s1 = inlined_call_operand.vmem [shape: f32[60,60], index: 1, kind: input, shape index: {}]   ;;  %s1407_s0 = inlined_call_operand.vmem [shape: f32[32,60], index: 0, kind: input, shape index: {}]   ;;  %s1408_s3 = inlined_call_operand.vmem [shape: f32[60,60], index: 3, kind: input, shape index: {}]   ;;  %s1409_s2 = inlined_call_operand.vmem [shape: f32[1,60], index: 2, kind: input, shape index: {}]   ;;  %s1410_s5 = inlined_call_operand.vmem [shape: f32[60,10], index: 5, kind: input, shape index: {}]   ;;  %s1411_s4 = inlined_call_operand.vmem [shape: f32[60,10], index: 4, kind: input, shape index: {}]   ;;  %s1412_s8 = inlined_call_operand.<no memory space> [shape: f32[1,1], index: 8, kind: input, shape index: {}]   ;;  %s1413_s6 = inlined_call_operand.vmem [shape: f32[1,10], index: 6, kind: input, shape index: {}]   ;;  %s1414_s7 = inlined_call_operand.vmem [shape: f32[1,10], index: 7, kind: input, shape index: {}]   ;;  %s1415_s9 = inlined_call_operand.vmem [shape: f32[32,1], index: 9, kind: output, shape index: {}]  }
   0x1   :  { %v38_v0 = vld [vmem:[%s1406_s1] sm:$0xff]  ;;  %v39_v1 = vld [vmem:[%s1406_s1 + $0x8] sm:$0xff]  ;;  %v40_v2 = vld [vmem:[%s1406_s1 + $0x10] sm:$0xff]  ;;  %1052 = vmatprep.subr.bf16.mxu1 %v1130_v3  ;;  %942 = vmatprep.mubr.msk.f32.mxu1 %vm1131_vm1, %v1132_v6  ;;  %vm66_vm2 = vcmask 1043456   ;;  %vm1133_vm3 = vmmov 1   ;;  %v155_v31 = vlaneseq  ;;  %vm731_vm6 = vcmask 80896  }
   0x2   :  { %v1008_v4 = vpack.c.bf16 %v39_v1, %v38_v0  ;;  %v41_v5 = vld [vmem:[%s1406_s1 + $0x18] sm:$0xff]  ;;  %v42_v8 = vld [vmem:[%s1406_s1 + $0x20] sm:$0xff]  ;;  %v43_v9 = vld [vmem:[%s1406_s1 + $0x28] sm:$0xff]  ;;  %vm759_vm7 = vcmask 7168  }
   0x3   :  { %v1012_v7 = vpack.c.bf16 %v41_v5, %v40_v2  ;;  %v34_v10 = vld [vmem:[%s1407_s0] sm:$0xff]  ;;  %v159_v12 = vld [vmem:[%s1408_s3 + $0x8] sm:$0xff]  ;;  %v1016_v13 = vpack.c.bf16 %v43_v9, %v42_v8  ;;  %v44_v14 = vld [vmem:[%s1406_s1 + $0x30] sm:$0xff]  ;;  %v156_v34 = vand.u32 127, %v155_v31  ;;  %v14_v31 = vstv %s1412_s8 }
   0x4   :  { %1009 = vmatprep.subr.bf16.mxu0 %v1008_v4  ;;  %v158_v11 = vld [vmem:[%s1408_s3] sm:$0xff]  ;;  %882 = vmatprep.mubr.msk.f32.mxu0 %vm53_vm0, %v34_v10  ;;  %v45_v16 = vld [vmem:[%s1406_s1 + $0x38] sm:$0xf]  ;;  %v160_v17 = vld [vmem:[%s1408_s3 + $0x10] sm:$0xff]  ;;  %15 = vst [vmem:[#allocation4] sm:$0x1] %v14_v31 }
   0x5   :  { %1011 = vmatpush3.bf16.msra.mxu0 %v1008_v4  ;;  %v1218_v15 = vpack.c.bf16 %v159_v12, %v158_v11  ;;  %v161_v18 = vld [vmem:[%s1408_s3 + $0x18] sm:$0xff]  ;;  %v1020_v19 = vpack.c.bf16 %v45_v16, %v44_v14  ;;  %vm1233_vm4 = vmpackc.low %vm66_vm2, %vm1133_vm3  ;;  %v162_v22 = vld [vmem:[%s1408_s3 + $0x20] sm:$0xff]  ;;  %vm157_vm5 = vcmp.lt.s32.totalorder %v156_v34, 30 }
   0x6   :  { %1013 = vmatprep.subr.bf16.mxu0 %v1012_v7  ;;  %v1231_v20 = vpack.c.bf16 %v161_v18, %v160_v17  ;;  %v163_v23 = vld [vmem:[%s1408_s3 + $0x28] sm:$0xff]  ;;  %v164_v25 = vld [vmem:[%s1408_s3 + $0x30] sm:$0xff]  ;;  %v165_v26 = vld [vmem:[%s1408_s3 + $0x38] sm:$0xf] }
   0x7   :  { %1054 = vmatpush3.bf16.msra.mxu1 %v1218_v15  ;;  %v1247_v24 = vpack.c.bf16 %v163_v23, %v162_v22  ;;  %v35_v27 = vld [vmem:[%s1407_s0 + $0x8] sm:$0xff]  ;;  %v36_v28 = vld [vmem:[%s1407_s0 + $0x10] sm:$0xff]  ;;  %v1036_v29 = vpack.c.bf16 %v165_v26, %v164_v25  ;;  %v37_v30 = vld [vmem:[%s1407_s0 + $0x18] sm:$0xff] }
   0x8   :  { %1055 = vmatprep.subr.bf16.mxu1 %v1130_v3  ;;  %v768_v32 = vld [vmem:[%s1409_s2] ss:$0 sm:$0xff]  ;;  %v498_v59 = vld [vmem:[%s1410_s5 + $0x8] sm:$0xff]  ;;  %v499_v61 = vld [vmem:[%s1410_s5 + $0x10] sm:$0xff] }
   0x9   :  { %1015 = vmatpush3.bf16.msra.mxu0 %v1012_v7  ;;  %v497_v58 = vld [vmem:[%s1410_s5] sm:$0xff]  ;;  %v500_v62 = vld [vmem:[%s1410_s5 + $0x18] sm:$0xff]  ;;  %v502_v1 = vld [vmem:[%s1410_s5 + $0x28] sm:$0xff] }
   0xa   :  { %1017 = vmatprep.subr.bf16.mxu0 %v1016_v13  ;;  %v1078_v60 = vpack.c.bf16 %v498_v59, %v497_v58  ;;  %v1082_v63 = vpack.c.bf16 %v500_v62, %v499_v61  ;;  %v501_v0 = vld [vmem:[%s1410_s5 + $0x20] sm:$0xff]  ;;  %v504_v4 = vld [vmem:[%s1410_s5 + $0x38] sm:$0xf]  ;;  %v486_v7 = vld [vmem:[%s1411_s4 + $0x8] sm:$0xff] }
   0xb   :  { %1057 = vmatpush3.bf16.msra.mxu1 %v1231_v20  ;;  %v1086_v2 = vpack.c.bf16 %v502_v1, %v501_v0  ;;  %v488_v14 = vld [vmem:[%s1411_s4 + $0x18] sm:$0xff]  ;;  %v489_v18 = vld [vmem:[%s1411_s4 + $0x20] sm:$0xff] }
   0xc   :  { %1058 = vmatprep.subr.bf16.mxu1 %v1130_v3  ;;  %v492_v25 = vld [vmem:[%s1411_s4 + $0x38] sm:$0xf] }
   0xd   :  { %1019 = vmatpush3.bf16.msra.mxu0 %v1016_v13  ;;  %v487_v13 = vld [vmem:[%s1411_s4 + $0x10] sm:$0xff] }
   0xe   :  { %1022 = vmatprep.subr.msk.bf16.mxu0 %vm1233_vm4, %v1020_v19  ;;  %v1100_v16 = vpack.c.bf16 %v488_v14, %v487_v13 }
   0xf   :  { %1060 = vmatpush3.bf16.msra.mxu1 %v1247_v24 }
  0x10   :  { %1061 = vmatprep.subr.bf16.mxu1 %v1130_v3 }
  0x11   :  { %1025 = vmatpush3.bf16.msk.msra.mxu0 %vm1233_vm4, %v1020_v19  ;;  %v490_v19 = vld [vmem:[%s1411_s4 + $0x28] sm:$0xff] }
  0x12   :  { %1026 = vmatprep.subr.bf16.mxu0 %v1130_v3  ;;  %v1104_v22 = vpack.c.bf16 %v490_v19, %v489_v18 }
  0x13   :  { %1064 = vmatpush3.bf16.msk.msra.mxu1 %vm1233_vm4, %v1036_v29 }
  0x14   :  { %883 = vmatmul.mubr.msk.f32.vlgmr.msra.gmra.mrb[0].mxu0 %vm53_vm0, %v35_v27  ;;  %1079 = vmatprep.subr.bf16.mxu1 %v1078_v60 }
  0x15   :  { %1028 = vmatpush3.bf16.msra.mxu0 %v1218_v15  ;;  %885 = vmatprep.mubr.msk.f32.mxu0 %vm53_vm0, %v36_v28 }
  0x16   :  { %1029 = vmatprep.subr.bf16.mxu0 %v1130_v3 }
  0x18   :  { %886 = vmatmul.mubr.msk.f32.gmra.mrb[2].mxu0 %vm53_vm0, %v37_v30 }
  0x19   :  { %1031 = vmatpush3.bf16.msra.mxu0 %v1231_v20  ;;  %904 = vmatprep.mubr.msk.f32.mxu0 %vm1131_vm1, %v1132_v6 }
  0x1a   :  { %1032 = vmatprep.subr.bf16.mxu0 %v1130_v3 }
  0x1d   :  { %1034 = vmatpush3.bf16.msra.mxu0 %v1247_v24 }
  0x1e   :  { %1035 = vmatprep.subr.bf16.mxu0 %v1130_v3 }
  0x21   :  { %1038 = vmatpush3.bf16.msk.msra.mxu0 %vm1233_vm4, %v1036_v29 }
  0x22   :  { %1039 = vmatprep.subr.bf16.mxu0 %v1130_v3 }
  0x24   :  { %905 = vmatmul.mubr.f32.vlgmr.msra.gmra.mrb[4].mxu0 %v1132_v6 }
  0x25   :  { %1041 = vmatpush3.bf16.msra.mxu0 %v1218_v15  ;;  %923 = vmatprep.mubr.msk.f32.mxu0 %vm1131_vm1, %v1132_v6 }
  0x26   :  { %1042 = vmatprep.subr.bf16.mxu0 %v1130_v3 }
  0x29   :  { %1044 = vmatpush3.bf16.msra.mxu0 %v1231_v20 }
  0x2a   :  { %1045 = vmatprep.subr.bf16.mxu0 %v1130_v3 }
  0x2d   :  { %1047 = vmatpush3.bf16.msra.mxu0 %v1247_v24 }
  0x2e   :  { %1048 = vmatprep.subr.bf16.mxu0 %v1130_v3 }
  0x31   :  { %1051 = vmatpush3.bf16.msk.msra.mxu0 %vm1233_vm4, %v1036_v29 }
  0x32   :  { %1065 = vmatprep.subr.bf16.mxu0 %v1130_v3 }
  0xe7   :  { %v884_v33 = vpop.f32.mrb[0].mxu0 }
  0xe8   :  { %v142_v35 = vadd.f32 %v884_v33, %v768_v32  ;;  %v136_v36 = vpop.f32.mrb[1].mxu0 }
  0xe9   :  { %v137_v38 = vadd.f32 %v768_v32, %v136_v36  ;;  %v792_v36 = vld [vmem:[%s1414_s7] ss:$0 sm:$0xff] }
  0xeb   :  { %v887_v37 = vpop.f32.mrb[2].mxu0 }
  0xec   :  { %v152_v39 = vadd.f32 %v887_v37, %v768_v32  ;;  %v146_v40 = vpop.f32.mrb[3].mxu0 }
  0xed   :  { %v147_v41 = vadd.f32 %v768_v32, %v146_v40  ;;  %v791_v32 = vld [vmem:[%s1413_s6] ss:$0 sm:$0xff] }
  0xee   :  { %v166_v42 = vsel %vm157_vm5, %v137_v38, %v152_v39  ;;  %v403_v43 = vsel %vm157_vm5, %v152_v39, %v137_v38 }
  0xef   :  { %v247_v44 = vsel %vm157_vm5, %v142_v35, %v147_v41  ;;  %v325_v45 = vsel %vm157_vm5, %v147_v41, %v142_v35 }
  0xf7   :  { %v239_v46 = vpop.f32.mrb[4].mxu0 }
  0xf8   :  { %v243_v47 = vadd.f32 %v239_v46, %v166_v42  ;;  %v906_v48 = vpop.f32.mrb[5].mxu0 }
  0xfa   :  { %1122 = vtanh.f32 %v243_v47 }
 0x104   :  { %v1123_v49 = vpop.eup %1122 }
 0x105   :  { %245 = vst.msk [vmem:[#allocation2] sm:$0xff] %vm53_vm0, %v1123_v49  ;;  %246 = vst.msk [vmem:[#allocation3 + $0x18] sm:$0xff] %vm53_vm0, %v1123_v49  ;;  %924 = vmatmul.mubr.msk.f32.vlgmr.msra.gmra.mrb[6].mxu0 %vm53_vm0, %v1123_v49 }
 0x106   :  { %1067 = vmatpush3.bf16.msra.mxu0 %v1218_v15  ;;  %961 = vmatprep.mubr.msk.f32.mxu0 %vm1131_vm1, %v1132_v6  ;;  %v485_v6 = vld [vmem:[%s1411_s4] sm:$0xff] }
 0x107   :  { %1068 = vmatprep.subr.bf16.mxu0 %v1130_v3  ;;  %v1096_v8 = vpack.c.bf16 %v486_v7, %v485_v6 }
 0x10a   :  { %1070 = vmatpush3.bf16.msra.mxu0 %v1231_v20 }
 0x10b   :  { %1071 = vmatprep.subr.bf16.mxu0 %v1130_v3 }
 0x10c   :  { %v496_v23 = vld [vmem:[#allocation3 + $0x18] sm:$0xff]  ;;  %v481_v26 = vld [vmem:[#allocation2] sm:$0xff] }
 0x10e   :  { %1073 = vmatpush3.bf16.msra.mxu0 %v1247_v24  ;;  %v491_v24 = vld [vmem:[%s1411_s4 + $0x30] sm:$0xff] }
 0x10f   :  { %1074 = vmatprep.subr.bf16.mxu0 %v1130_v3  ;;  %v503_v3 = vld [vmem:[%s1410_s5 + $0x30] sm:$0xff]  ;;  %v1108_v27 = vpack.c.bf16 %v492_v25, %v491_v24 }
 0x110   :  { %v1090_v5 = vpack.c.bf16 %v504_v4, %v503_v3 }
 0x112   :  { %1077 = vmatpush3.bf16.msk.msra.mxu0 %vm1233_vm4, %v1036_v29 }
 0x1d8   :  { %v317_v50 = vpop.f32.mrb[6].mxu0 }
 0x1d9   :  { %v321_v51 = vadd.f32 %v317_v50, %v247_v44  ;;  %v925_v52 = vpop.f32.mrb[7].mxu0 }
 0x1db   :  { %1124 = vtanh.f32 %v321_v51 }
 0x1e5   :  { %v1125_v53 = vpop.eup %1124 }
 0x1e6   :  { %323 = vst.msk [vmem:[#allocation2 + $0x8] sm:$0xff] %vm53_vm0, %v1125_v53  ;;  %324 = vst.msk [vmem:[#allocation3 + $0x10] sm:$0xff] %vm53_vm0, %v1125_v53  ;;  %943 = vmatmul.mubr.msk.f32.vlgmr.msra.gmra.mrb[0].mxu1 %vm53_vm0, %v1125_v53  ;;  %v793_v53 = vld [vmem:[#allocation4] ss:$0 sm:$0xff] }
 0x1e7   :  { %1081 = vmatpush3.bf16.msra.mxu1 %v1078_v60 }
 0x1e8   :  { %1083 = vmatprep.subr.bf16.mxu1 %v1082_v63 }
 0x1eb   :  { %1085 = vmatpush3.bf16.msra.mxu1 %v1082_v63 }
 0x1ec   :  { %1087 = vmatprep.subr.bf16.mxu1 %v1086_v2 }
 0x1ed   :  { %v495_v20 = vld [vmem:[#allocation3 + $0x10] sm:$0xff]  ;;  %v482_v28 = vld [vmem:[#allocation2 + $0x8] sm:$0xff] }
 0x1ef   :  { %1089 = vmatpush3.bf16.msra.mxu1 %v1086_v2 }
 0x1f0   :  { %1092 = vmatprep.subr.msk.bf16.mxu1 %vm1233_vm4, %v1090_v5 }
 0x1f3   :  { %1095 = vmatpush3.bf16.msk.msra.mxu1 %vm1233_vm4, %v1090_v5 }
 0x1f4   :  { %1097 = vmatprep.subr.bf16.mxu1 %v1096_v8 }
 0x2b9   :  { %v395_v54 = vpop.f32.mrb[0].mxu1 }
 0x2ba   :  { %v399_v55 = vadd.f32 %v395_v54, %v325_v45  ;;  %v944_v56 = vpop.f32.mrb[1].mxu1 }
 0x2bc   :  { %1126 = vtanh.f32 %v399_v55 }
 0x2c6   :  { %v1127_v57 = vpop.eup %1126 }
 0x2c7   :  { %401 = vst.msk [vmem:[#allocation2 + $0x10] sm:$0xff] %vm53_vm0, %v1127_v57  ;;  %402 = vst.msk [vmem:[#allocation3 + $0x8] sm:$0xff] %vm53_vm0, %v1127_v57  ;;  %962 = vmatmul.mubr.msk.f32.vlgmr.msra.gmra.mrb[8].mxu0 %vm53_vm0, %v1127_v57 }
 0x2ce   :  { %v494_v17 = vld [vmem:[#allocation3 + $0x8] sm:$0xff]  ;;  %v483_v29 = vld [vmem:[#allocation2 + $0x10] sm:$0xff] }
 0x39a   :  { %v473_v9 = vpop.f32.mrb[8].mxu0 }
 0x39b   :  { %v477_v10 = vadd.f32 %v473_v9, %v403_v43  ;;  %v963_v11 = vpop.f32.mrb[9].mxu0 }
 0x39d   :  { %1128 = vtanh.f32 %v477_v10 }
 0x3a7   :  { %v1129_v12 = vpop.eup %1128 }
 0x3a8   :  { %479 = vst.msk [vmem:[#allocation2 + $0x18] sm:$0xff] %vm53_vm0, %v1129_v12  ;;  %480 = vst.msk [vmem:[#allocation3] sm:$0xff] %vm53_vm0, %v1129_v12 }
 0x3af   :  { %v493_v15 = vld [vmem:[#allocation3] sm:$0xff]  ;;  %v484_v30 = vld [vmem:[#allocation2 + $0x18] sm:$0xff] }
 0x3b0   :  { %980 = vmatprep.mubr.msk.f32.mxu1 %vm53_vm0, %v493_v15 }
 0x3b1   :  { %981 = vmatmul.mubr.msk.f32.vlgmr.msra.gmra.mrb[2].mxu1 %vm53_vm0, %v494_v17 }
 0x3b2   :  { %1099 = vmatpush3.bf16.msra.mxu1 %v1096_v8  ;;  %983 = vmatprep.mubr.msk.f32.mxu1 %vm53_vm0, %v495_v20 }
 0x3b3   :  { %1101 = vmatprep.subr.bf16.mxu1 %v1100_v16 }
 0x3b5   :  { %984 = vmatmul.mubr.msk.f32.gmra.mrb[4].mxu1 %vm53_vm0, %v496_v23 }
 0x3b6   :  { %1103 = vmatpush3.bf16.msra.mxu1 %v1100_v16  ;;  %1002 = vmatprep.mubr.msk.f32.mxu1 %vm53_vm0, %v481_v26 }
 0x3b7   :  { %1105 = vmatprep.subr.bf16.mxu1 %v1104_v22 }
 0x3ba   :  { %1107 = vmatpush3.bf16.msra.mxu1 %v1104_v22 }
 0x3bb   :  { %1110 = vmatprep.subr.msk.bf16.mxu1 %vm1233_vm4, %v1108_v27 }
 0x3be   :  { %1113 = vmatpush3.bf16.msk.msra.mxu1 %vm1233_vm4, %v1108_v27 }
 0x3c1   :  { %1003 = vmatmul.mubr.msk.f32.vlgmr.msra.gmra.mrb[2].mxu1 %vm53_vm0, %v482_v28 }
 0x3c2   :  { %1005 = vmatprep.mubr.msk.f32.mxu1 %vm53_vm0, %v483_v29 }
 0x3c5   :  { %1006 = vmatmul.mubr.msk.f32.gmra.mrb[4].mxu1 %vm53_vm0, %v484_v30 }
 0x494   :  { %v1004_v21 = vpop.f32.mrb[2].mxu1 }
 0x495   :  { %v713_v33 = vadd.f32 %v1004_v21, %v791_v32  ;;  %v686_v34 = vpop.f32.mrb[3].mxu1 }
 0x496   :  { %v712_v35 = vadd.f32 %v791_v32, %v686_v34 }
 0x497   :  { %v717_v37 = vmax.f32 %v713_v33, 0.0 }
 0x498   :  { %v716_v38 = vmax.f32 %v712_v35, 0.0  ;;  %v1007_v39 = vpop.f32.mrb[4].mxu1 }
 0x499   :  { %v715_v40 = vadd.f32 %v1007_v39, %v791_v32  ;;  %v696_v41 = vpop.f32.mrb[5].mxu1  ;;  %v728_v47 = vmul.f32 %v792_v36, %v717_v37 }
 0x49a   :  { %v714_v42 = vadd.f32 %v791_v32, %v696_v41  ;;  %v727_v43 = vmul.f32 %v792_v36, %v716_v38 }
 0x49b   :  { %v719_v44 = vmax.f32 %v715_v40, 0.0  ;;  %v735_v49 = vsel %vm731_vm6, %v728_v47, 0.0 }
 0x49c   :  { %v718_v45 = vmax.f32 %v714_v42, 0.0  ;;  %v732_v46 = vsel %vm731_vm6, %v727_v43, 0.0 }
 0x49d   :  { %733 = vadd.xlane.f32.xlu0 %v732_v46  ;;  %v730_v51 = vmul.f32 %v792_v36, %v719_v44 }
 0x49e   :  { %v729_v48 = vmul.f32 %v792_v36, %v718_v45 }
 0x49f   :  { %v741_v52 = vsel %vm731_vm6, %v730_v51, 0.0 }
 0x4a0   :  { %v738_v50 = vsel %vm731_vm6, %v729_v48, 0.0 }
 0x4a1   :  { %736 = vadd.xlane.f32.xlu0 %v735_v49  ;;  %739 = vadd.xlane.f32.xlu1 %v738_v50 }
 0x4a5   :  { %742 = vadd.xlane.f32.xlu1 %v741_v52 }
 0x52a   :  { %v734_v54 = vpop.xlane.xlu0 %733 }
 0x52b   :  { %v751_v55 = vadd.f32 %v793_v53, %v734_v54 }
 0x52d   :  { %v755_v56 = vmax.f32 %v751_v55, 0.0 }
 0x52e   :  { %v737_v57 = vpop.xlane.xlu0 %736  ;;  %v740_v58 = vpop.xlane.xlu1 %739 }
 0x52f   :  { %760 = vst.msk [vmem:[%s1415_s9] sm:$0xff] %vm759_vm7, %v755_v56  ;;  %v752_v59 = vadd.f32 %v793_v53, %v737_v57  ;;  %v753_v60 = vadd.f32 %v793_v53, %v740_v58 }
 0x531   :  { %v756_v61 = vmax.f32 %v752_v59, 0.0  ;;  %v757_v62 = vmax.f32 %v753_v60, 0.0 }
 0x532   :  { %v743_v63 = vpop.xlane.xlu1 %742 }
 0x533   :  { %761 = vst.msk [vmem:[%s1415_s9 + $0x8] sm:$0xff] %vm759_vm7, %v756_v61  ;;  %762 = vst.msk [vmem:[%s1415_s9 + $0x10] sm:$0xff] %vm759_vm7, %v757_v62  ;;  %v754_v0 = vadd.f32 %v793_v53, %v743_v63 }
 0x535   :  { %v758_v1 = vmax.f32 %v754_v0, 0.0 }
 0x537   :  { %763 = vst.msk [vmem:[%s1415_s9 + $0x18] sm:$0xff] %vm759_vm7, %v758_v1 }

</bundles_post_ra>
